<compile_context>
chip_gen: v7x
topology: tpu7x:2x2x1
jax: 0.10.0
libtpu: 0.0.40
codegen_flags: <defaults>
</compile_context>

<pallas_src>
import jax
import jax.numpy as jnp
from jax.experimental import pallas as pl
from jax.experimental.pallas import tpu as pltpu


def decoder_kernel(z_ref, w1_ref, b1_ref, w2_ref, b2_ref, o_ref):
    # z_ref : (latent, block_b)   batch on the lane axis (lane-dense)
    # w1_ref: (middle, latent)    b1_ref: (middle, 1)
    # w2_ref: (out,    middle)    b2_ref: (out,    1)
    # o_ref : (out,    block_b)   batch on the lane axis (lane-dense)
    h = jnp.dot(w1_ref[...], z_ref[...],
                preferred_element_type=jnp.float32)           # (middle, block_b), f32 acc
    h = jnp.maximum(h + b1_ref[...], 0.0)                     # bias + ReLU in f32
    y = jnp.dot(w2_ref[...], h.astype(w2_ref.dtype),
                preferred_element_type=jnp.float32)           # (out, block_b), f32 acc
    y = y + b2_ref[...]
    o_ref[...] = jax.nn.sigmoid(y).astype(o_ref.dtype)        # sigmoid in f32 (EUP), cast on store


def decoder_forward(z, w1, b1, w2, b2, *, output_dim, block_b=1024, io_dtype=None):
    """z: (..., latent). w1: (latent, middle). b1: (middle,).
       w2: (middle, output). b2: (output,).  Returns (-1, 1, output_dim).

       io_dtype: dtype of the streamed z / y arrays (e.g. jnp.bfloat16 on
       v6e/v7x for ~2x HBM-bandwidth win); accumulation stays f32."""
    latent = w1.shape[0]
    middle = w1.shape[1]
    out = w2.shape[1]
    assert out == output_dim
    assert z.shape[-1] == latent

    out_dtype = z.dtype
    z2d = z.reshape(-1, latent)                 # nn.Linear flattens leading dims
    B = z2d.shape[0]

    io_dtype = jnp.dtype(io_dtype) if io_dtype is not None else z2d.dtype

    # --- batch tiling: lane-aligned (multiple of 128), bounded VMEM ---------
    b_pad128 = max(128, pl.cdiv(B, 128) * 128)
    block_b = max(128, (min(block_b, b_pad128) // 128) * 128)
    B_pad = pl.cdiv(b_pad128, block_b) * block_b
    grid_b = B_pad // block_b

    # --- transpose + pad at the boundary (pure XLA glue, tiny arrays) -------
    z_padT = jnp.pad(z2d, ((0, B_pad - B), (0, 0))).T.astype(io_dtype)  # (latent, B_pad)
    w1t = w1.T.astype(io_dtype)                                         # (middle, latent)
    w2t = w2.T.astype(io_dtype)                                         # (out, middle)
    b1_2d = b1.reshape(middle, 1).astype(jnp.float32)
    b2_2d = b2.reshape(out, 1).astype(jnp.float32)

    # --- VMEM budget: double-buffered streamed tiles + resident weights -----
    bpe = io_dtype.itemsize
    tile_bytes = 2 * block_b * (latent + out) * bpe            # double-buffered z / y tiles
    weight_bytes = (middle * latent + out * middle) * bpe + (middle + out) * 4
    vmem_limit = int(min(max(4 * (tile_bytes + weight_bytes), 4 << 20), 32 << 20))

    cost = pl.CostEstimate(
        flops=2 * B * (latent * middle + middle * out),
        transcendentals=B * out,
        bytes_accessed=(B * (latent + out) * bpe
                        + (middle * latent + out * middle) * bpe
                        + (middle + out) * 4),
    )

    yT = pl.pallas_call(
        decoder_kernel,
        out_shape=jax.ShapeDtypeStruct((out, B_pad), io_dtype),
        grid_spec=pl.GridSpec(
            grid=(grid_b,),
            in_specs=[
                pl.BlockSpec((latent, block_b), lambda i: (0, i)),   # z^T tile (streamed)
                pl.BlockSpec((middle, latent), lambda i: (0, 0)),    # W1^T (VMEM-resident)
                pl.BlockSpec((middle, 1), lambda i: (0, 0)),         # b1
                pl.BlockSpec((out, middle), lambda i: (0, 0)),       # W2^T (VMEM-resident)
                pl.BlockSpec((out, 1), lambda i: (0, 0)),            # b2
            ],
            out_specs=pl.BlockSpec((out, block_b), lambda i: (0, i)),
        ),
        compiler_params=pltpu.CompilerParams(
            dimension_semantics=("parallel",),      # batch tiles independent -> megacore
            vmem_limit_bytes=vmem_limit,
        ),
        cost_estimate=cost,
    )(z_padT, w1t, b1_2d, w2t, b2_2d)

    # Strip batch padding, undo transpose, reshape((-1, 1, output_dim)) — XLA glue.
    y = yT[:, :B].T.astype(out_dtype)
    return y.reshape(-1, 1, output_dim)


def init_decoder_params(key, latent_dims, middle_dim, output_dim):
    """Deterministic synthetic init mirroring nn.Linear parameter shapes.
       Weights stored transposed vs PyTorch: (in_features, out_features)."""
    k1, k2, k3, k4 = jax.random.split(key, 4)
    s1 = 1.0 / jnp.sqrt(latent_dims)
    s2 = 1.0 / jnp.sqrt(middle_dim)
    w1 = jax.random.uniform(k1, (latent_dims, middle_dim),
                            minval=-s1, maxval=s1, dtype=jnp.float32)
    b1 = jax.random.uniform(k2, (middle_dim,),
                            minval=-s1, maxval=s1, dtype=jnp.float32)
    w2 = jax.random.uniform(k3, (middle_dim, output_dim),
                            minval=-s2, maxval=s2, dtype=jnp.float32)
    b2 = jax.random.uniform(k4, (output_dim,),
                            minval=-s2, maxval=s2, dtype=jnp.float32)
    return w1, b1, w2, b2


def _reference(z, w1, b1, w2, b2, output_dim):
    h = jnp.maximum(z.reshape(-1, w1.shape[0]) @ w1 + b1, 0.0)
    return jax.nn.sigmoid(h @ w2 + b2).reshape(-1, 1, output_dim)


if __name__ == "__main__":
    latent_dims, middle_dim, output_dim = 8, 32, 16

    key = jax.random.PRNGKey(0)
    kz, kp, kz2 = jax.random.split(key, 3)
    w1, b1, w2, b2 = init_decoder_params(kp, latent_dims, middle_dim, output_dim)

    # Small batch (single grid step, padded 8 -> 128).
    batch = 8
    z = jax.random.normal(kz, (batch, latent_dims), dtype=jnp.float32)
    out = decoder_forward(z, w1, b1, w2, b2, output_dim=output_dim)
    out = jax.block_until_ready(out)
    ref = _reference(z, w1, b1, w2, b2, output_dim)
    assert out.shape == (batch, 1, output_dim)
    assert jnp.allclose(out, ref, atol=1e-5, rtol=1e-5)

    # Larger, non-aligned batch (exercises multi-step pipelined grid + padding).
    batch2 = 2500
    z2 = jax.random.normal(kz2, (batch2, latent_dims), dtype=jnp.float32)
    out2 = decoder_forward(z2, w1, b1, w2, b2, output_dim=output_dim)
    out2 = jax.block_until_ready(out2)
    ref2 = _reference(z2, w1, b1, w2, b2, output_dim)
    assert out2.shape == (batch2, 1, output_dim)
    assert jnp.allclose(out2, ref2, atol=1e-5, rtol=1e-5)

    # TODO(synk): on v6e/v7x pass io_dtype=jnp.bfloat16 for ~2x HBM-bandwidth
    # win on the streamed z/y arrays (relax the allclose tolerance if checked).

    print("KERNEL_OK")
</pallas_src>

<mosaic_0001>
module attributes {stable_mosaic.version = 11 : i64} {
  func.func @decoder_kernel(%arg0: i32, %arg1: memref<8x128xf32, #tpu.memory_space<vmem>>, %arg2: memref<32x8xf32, #tpu.memory_space<vmem>>, %arg3: memref<32x1xf32, #tpu.memory_space<vmem>>, %arg4: memref<16x32xf32, #tpu.memory_space<vmem>>, %arg5: memref<16x1xf32, #tpu.memory_space<vmem>>, %arg6: memref<16x128xf32, #tpu.memory_space<vmem>>) attributes {dimension_semantics = [#tpu.dimension_semantics<parallel>], iteration_bounds = array<i64: 1>, scalar_prefetch = 0 : i64, scratch_operands = 0 : i64, tpu.core_type = #tpu.core_type<tc>, window_params = [{transform_indices = @transform_0, window_bounds = array<i64: 8, 128>}, {pipeline_mode = #tpu.pipeline_mode<synchronous>, transform_indices = @transform_1, window_bounds = array<i64: 32, 8>}, {pipeline_mode = #tpu.pipeline_mode<synchronous>, transform_indices = @transform_2, window_bounds = array<i64: 32, 1>}, {pipeline_mode = #tpu.pipeline_mode<synchronous>, transform_indices = @transform_3, window_bounds = array<i64: 16, 32>}, {pipeline_mode = #tpu.pipeline_mode<synchronous>, transform_indices = @transform_4, window_bounds = array<i64: 16, 1>}, {transform_indices = @transform_5, window_bounds = array<i64: 16, 128>}]} {
    %c0 = arith.constant 0 : index
    %c0_0 = arith.constant 0 : index
    %0 = vector.load %arg2[%c0, %c0_0] : memref<32x8xf32, #tpu.memory_space<vmem>>, vector<32x8xf32>
    %c0_1 = arith.constant 0 : index
    %c0_2 = arith.constant 0 : index
    %1 = vector.load %arg1[%c0_1, %c0_2] : memref<8x128xf32, #tpu.memory_space<vmem>>, vector<8x128xf32>
    %cst = arith.constant dense<0.000000e+00> : vector<32x128xf32>
    %2 = tpu.matmul %0, %1, %cst {dimension_numbers = #tpu.dot_dimension_numbers<[1], [0], [0], [1], [0, 0, 1, 1], [], []>} : vector<32x8xf32>, vector<8x128xf32>, vector<32x128xf32> -> vector<32x128xf32>
    %c0_3 = arith.constant 0 : index
    %c0_4 = arith.constant 0 : index
    %3 = vector.load %arg3[%c0_3, %c0_4] : memref<32x1xf32, #tpu.memory_space<vmem>>, vector<32x1xf32>
    %4 = vector.broadcast %3 : vector<32x1xf32> to vector<32x128xf32>
    %5 = arith.addf %2, %4 : vector<32x128xf32>
    %cst_5 = arith.constant 0.000000e+00 : f32
    %6 = vector.broadcast %cst_5 : f32 to vector<32x128xf32>
    %7 = arith.maximumf %5, %6 : vector<32x128xf32>
    %c0_6 = arith.constant 0 : index
    %c0_7 = arith.constant 0 : index
    %8 = vector.load %arg4[%c0_6, %c0_7] : memref<16x32xf32, #tpu.memory_space<vmem>>, vector<16x32xf32>
    %cst_8 = arith.constant dense<0.000000e+00> : vector<16x128xf32>
    %9 = tpu.matmul %8, %7, %cst_8 {dimension_numbers = #tpu.dot_dimension_numbers<[1], [0], [0], [1], [0, 0, 1, 1], [], []>} : vector<16x32xf32>, vector<32x128xf32>, vector<16x128xf32> -> vector<16x128xf32>
    %c0_9 = arith.constant 0 : index
    %c0_10 = arith.constant 0 : index
    %10 = vector.load %arg5[%c0_9, %c0_10] : memref<16x1xf32, #tpu.memory_space<vmem>>, vector<16x1xf32>
    %11 = vector.broadcast %10 : vector<16x1xf32> to vector<16x128xf32>
    %12 = arith.addf %9, %11 : vector<16x128xf32>
    %13 = arith.negf %12 : vector<16x128xf32>
    %14 = math.exp %13 : vector<16x128xf32>
    %cst_11 = arith.constant 1.000000e+00 : f32
    %15 = vector.broadcast %cst_11 : f32 to vector<16x128xf32>
    %16 = arith.addf %15, %14 : vector<16x128xf32>
    %17 = arith.divf %15, %16 : vector<16x128xf32>
    %c0_12 = arith.constant 0 : index
    %c0_13 = arith.constant 0 : index
    %18 = vector.load %arg6[%c0_12, %c0_13] : memref<16x128xf32, #tpu.memory_space<vmem>>, vector<16x128xf32>
    tpu.vector_store %arg6[%c0_12, %c0_13], %17 {strides = array<i32>} : memref<16x128xf32, #tpu.memory_space<vmem>>, vector<16x128xf32>,
    return
  }
  func.func @transform_0(%arg0: i32) -> (i32, i32) {
    %c0_i32 = arith.constant 0 : i32
    %c0_i32_0 = arith.constant 0 : i32
    return %c0_i32, %arg0 : i32, i32
  }
  func.func @transform_1(%arg0: i32) -> (i32, i32) {
    %c0_i32 = arith.constant 0 : i32
    %c0_i32_0 = arith.constant 0 : i32
    %c0_i32_1 = arith.constant 0 : i32
    return %c0_i32, %c0_i32_0 : i32, i32
  }
  func.func @transform_2(%arg0: i32) -> (i32, i32) {
    %c0_i32 = arith.constant 0 : i32
    %c0_i32_0 = arith.constant 0 : i32
    %c0_i32_1 = arith.constant 0 : i32
    return %c0_i32, %c0_i32_0 : i32, i32
  }
  func.func @transform_3(%arg0: i32) -> (i32, i32) {
    %c0_i32 = arith.constant 0 : i32
    %c0_i32_0 = arith.constant 0 : i32
    %c0_i32_1 = arith.constant 0 : i32
    return %c0_i32, %c0_i32_0 : i32, i32
  }
  func.func @transform_4(%arg0: i32) -> (i32, i32) {
    %c0_i32 = arith.constant 0 : i32
    %c0_i32_0 = arith.constant 0 : i32
    %c0_i32_1 = arith.constant 0 : i32
    return %c0_i32, %c0_i32_0 : i32, i32
  }
  func.func @transform_5(%arg0: i32) -> (i32, i32) {
    %c0_i32 = arith.constant 0 : i32
    %c0_i32_0 = arith.constant 0 : i32
    return %c0_i32, %arg0 : i32, i32
  }
}

</mosaic_0001>

<bundles_post_ra>
// kernel: tpu_custom_call.1
= control target key start
LH: loop header
LB: loop body
LE: loop exit
PB: predicated region body
PF: predicated region fallthrough
CT: control target
= control target key end

     0   :  { %vm50_vm0 = vcmask 64512   ;;  %v362_v5 = vmov 0   ;;  %s453_s0 = inlined_call_operand.vmem [shape: f32[8,128], index: 0, kind: input, shape index: {}]   ;;  %s454_s1 = inlined_call_operand.vmem [shape: f32[32,8], index: 1, kind: input, shape index: {}]   ;;  %s455_s2 = inlined_call_operand.vmem [shape: f32[32,1], index: 2, kind: input, shape index: {}]   ;;  %s456_s3 = inlined_call_operand.vmem [shape: f32[16,32], index: 3, kind: input, shape index: {}]   ;;  %s457_s4 = inlined_call_operand.vmem [shape: f32[16,1], index: 4, kind: input, shape index: {}]   ;;  %s458_s5 = inlined_call_operand.hbm [shape: f32[16,128], index: 5, kind: output, shape index: {}]  }
   0x1   :  { %v25_v0 = vld [vmem:[%s453_s0] sm:$0xff]  ;;  %v22_v2 = vld [vmem:[%s454_s1 + $0x8] sm:$0xff]  ;;  %v23_v3 = vld [vmem:[%s454_s1 + $0x10] sm:$0xff]  ;;  %328 = vset.pattern.permute.xlu0 %v362_v5 }
   0x2   :  { %v21_v1 = vld [vmem:[%s454_s1] sm:$0xff]  ;;  %297 = vmatprep.subr.mxu0 %v25_v0  ;;  %v28_v6 = vld [vmem:[%s455_s2 + $0x10] sm:$0xff] }
   0x3   :  { %299 = vmatprep.mubr.msk.f32.mxu0 %vm50_vm0, %v21_v1  ;;  %v26_v4 = vld [vmem:[%s455_s2] sm:$0xff]  ;;  %298 = vmatpush3.msra.mxu0 %v25_v0 }
   0x4   :  { %300 = vmatmul.mubr.msk.f32.vlgmr.msra.gmra.mrb[0].mxu0 %vm50_vm0, %v22_v2  ;;  %32 = vperm.xlu0 %328, %v26_v4  }
   0x5   :  { %10 = vsyncpa [#allocation3], 0  ;;  %302 = vmatprep.mubr.msk.f32.mxu0 %vm50_vm0, %v23_v3  ;;  %v24_v7 = vld [vmem:[%s454_s1 + $0x18] sm:$0xff]  ;;  %329 = vset.pattern.permute.xlu1 %v362_v5  ;;  %v27_v8 = vld [vmem:[%s455_s2 + $0x8] sm:$0xff]  ;;  %vm166_vm1 = vcmask 261120   ;;  %s363_s15 = smov [#allocation2]  }
   0x6   :  { %42 = vperm.xlu1 %329, %v28_v6   ;;  %v29_v9 = vld [vmem:[%s455_s2 + $0x18] sm:$0xff]  ;;  %v154_v10 = vld [vmem:[%s457_s4] sm:$0xff]  ;;  %v155_v11 = vld [vmem:[%s457_s4 + $0x8] sm:$0xff] }
   0x7   :  { %v152_v12 = vld [vmem:[%s456_s3] sm:$0xff]  ;;  %v153_v31 = vld [vmem:[%s456_s3 + $0x8] sm:$0xff]  ;;  %s267_s3 = sshll.u32 %s363_s15, 4  ;;  %s268_s3 = int_to_ptr.vmem [resolvable:$true] %s267_s3 }
   0x8   :  { %303 = vmatmul.mubr.msk.f32.gmra.mrb[2].mxu0 %vm50_vm0, %v24_v7  ;;  %37 = vperm.xlu0 %328, %v27_v8   ;;  %s338_s16 = scalar_lea.vmem %s268_s3, 256  ;;  %p343_p1 = scmp.lt.s32.totalorder %s268_s3, %s268_s3 }
   0x9   :  { %313 = vmatprep.mubr.msk.f32.mxu1 %vm166_vm1, %v152_v12  ;;  %p339_p0 = scmp.ne.s32.totalorder %s268_s3, %s338_s16  ;;  %p344_p2 = scmp.lt.s32.totalorder %s338_s16, %s338_s16 }
   0xa   :  { %47 = vperm.xlu1 %329, %v29_v9  }
   0xb   :  { %p345_p3 = por %p344_p2, %p343_p1 }
   0xc   :  { %158 = vperm.xlu0 %328, %v154_v10  }
   0xd   :  { %p346_p4 = pnand %p345_p3, %p339_p0 }
   0xe   :  { %163 = vperm.xlu1 %329, %v155_v11  }
  0x83   :  { %v33_v13 = vpop.permute.xlu0 %32 }
  0x85   :  { %v43_v14 = vpop.permute.xlu1 %42 }
  0x87   :  { %v38_v15 = vpop.permute.xlu0 %37 }
  0x89   :  { %v48_v21 = vpop.permute.xlu1 %47 }
  0x8b   :  { %v159_v34 = vpop.permute.xlu0 %158 }
  0x8d   :  { %v164_v32 = vpop.permute.xlu1 %163 }
  0xd7   :  { %v301_v16 = vpop.f32.mrb[0].mxu0 }
  0xd8   :  { %v135_v17 = vadd.f32 %v301_v16, %v38_v15  ;;  %v129_v18 = vpop.f32.mrb[1].mxu0 }
  0xd9   :  { %v130_v19 = vadd.f32 %v129_v18, %v33_v13 }
  0xda   :  { %v149_v20 = vmax.f32 %v135_v17, 0.0 }
  0xdb   :  { %v148_v22 = vmax.f32 %v130_v19, 0.0  ;;  %v304_v23 = vpop.f32.mrb[2].mxu0 }
  0xdc   :  { %v145_v24 = vadd.f32 %v304_v23, %v48_v21  ;;  %v139_v25 = vpop.f32.mrb[3].mxu0 }
  0xdd   :  { %v140_v26 = vadd.f32 %v139_v25, %v43_v14  ;;  %v316_v27 = vpack.c.bf16 %v149_v20, %v148_v22 }
  0xde   :  { %v151_v28 = vmax.f32 %v145_v24, 0.0 }
  0xdf   :  { %v150_v29 = vmax.f32 %v140_v26, 0.0  ;;  %317 = vmatprep.subr.bf16.mxu1 %v316_v27 }
  0xe0   :  { %319 = vmatpush3.bf16.msra.mxu1 %v316_v27 }
  0xe1   :  { %v320_v30 = vpack.c.bf16 %v151_v28, %v150_v29 }
  0xe3   :  { %321 = vmatprep.subr.bf16.mxu1 %v320_v30 }
  0xe4   :  { %323 = vmatpush3.bf16.msra.mxu1 %v320_v30 }
  0xe7   :  { %314 = vmatmul.mubr.msk.f32.vlgmr.msra.gmra.mrb[0].mxu1 %vm166_vm1, %v153_v31 }
 0x1ba   :  { %v315_v33 = vpop.f32.mrb[0].mxu1 }
 0x1bb   :  { %v245_v35 = vadd.f32 %v315_v33, %v164_v32  ;;  %v239_v36 = vpop.f32.mrb[1].mxu1 }
 0x1bc   :  { %v240_v37 = vadd.f32 %v239_v36, %v159_v34 }
 0x1bd   :  { %v285_v38 = vmul.f32 -1.442695, %v245_v35 }
 0x1be   :  { %v284_v39 = vmul.f32 -1.442695, %v240_v37 }
 0x1bf   :  { %330 = vpow2.f32 %v285_v38 }
 0x1c0   :  { %332 = vpow2.f32 %v284_v39 }
 0x1c9   :  { %v331_v40 = vpop.eup %330 }
 0x1ca   :  { %v333_v41 = vpop.eup %332  ;;  %v255_v42 = vadd.f32 1.0, %v331_v40 }
 0x1cb   :  { %v254_v43 = vadd.f32 1.0, %v333_v41 }
 0x1cc   :  { %334 = vrcp.f32 %v255_v42 }
 0x1cd   :  { %336 = vrcp.f32 %v254_v43 }
 0x1d6   :  { %v335_v44 = vpop.eup %334 }
 0x1d7   :  { %v337_v45 = vpop.eup %336  ;;  %261 = vst [vmem:[#allocation2 + $0x8] sm:$0xff] %v335_v44 }
 0x1d8   :  { %260 = vst [vmem:[#allocation2] sm:$0xff] %v337_v45 }
 0x1d9   :  { %349 = shalt.err (!%p346_p4)
}
 0x1da   :  { %s350_s19 = scalar_lea.hbm %s458_s5, 256 }
 0x1db   :  { %p351_p5 = scmp.ne.s32.totalorder %s458_s5, %s350_s19  ;;  %p354_p6 = scmp.lt.u32.totalorder %s350_s19, %s458_s5 }
 0x1dd   :  { %p356_p7 = pnand %p354_p6, %p351_p5 }
 0x1df   :  { %359 = shalt.err (!%p356_p7)
}
 0x1e0   :  { %s364_s24 = smov 128   ;;  %s365_s25 = smov 8  }
 0x1e1   :  { %273 = dma.vmem_to_hbm [thread:$0]  %s268_s3, 256, %s458_s5, [#allocation3], %s364_s24, %s364_s24, %s365_s25  }
 0x1e2   :  { %360 = dma.done.wait [#allocation3], 256  }
 0x1e3   :  { %361 = vsyncadd [#allocation3], 4294967040 }
 0x1e4   :  { %277 = vsyncpa [#allocation3], 1 }

</bundles_post_ra>
